<compile_context>
chip_gen: v7x
topology: tpu7x:2x2x1
jax: 0.10.0
libtpu: 0.0.40
codegen_flags: <defaults>
</compile_context>

<pallas_src>
import functools

import jax
import jax.numpy as jnp
from jax.experimental import pallas as pl
from jax.experimental.pallas import tpu as pltpu


# ----------------------------------------------------------------------------- kernel


def _vanet_kernel(n_hidden, x_ref, *refs):
    """Transposed trunk + fused head.

    x_ref:   (S, TB)      - batch in lanes
    params:  w_i (out, in) in compute dtype, b_i (out, 1) in f32, then fused head
             w_head (A+1, H), b_head (A+1, 1)
    out_ref: (A+1, TB)    - [adv_T ; v_T], f32
    """
    out_ref = refs[-1]
    p = refs[:-1]
    mxu_dtype = p[0].dtype

    h = x_ref[...]
    for i in range(n_hidden):
        w = p[2 * i][...]
        b = p[2 * i + 1][...]
        z = jnp.dot(w, h, preferred_element_type=jnp.float32) + b   # f32 bias-add
        h = jnp.maximum(z, 0.0).astype(mxu_dtype)                   # f32 ReLU, cast for next dot

    w_head = p[2 * n_hidden][...]       # (A+1, H) : [w_adv ; w_v]
    b_head = p[2 * n_hidden + 1][...]   # (A+1, 1)
    head = jnp.dot(w_head, h, preferred_element_type=jnp.float32) + b_head
    out_ref[...] = head.astype(out_ref.dtype)


# ----------------------------------------------------------------------------- wrapper


def _prep_params(params, compute_dtype):
    """Torch-layout params [w1,b1,...,w_adv,b_adv,w_v,b_v] (w: (out,in), b: (out,))
    -> [w1,b1,...,w_head,b_head] with fused (A+1,H) head, biases reshaped to (out,1) f32."""
    n_hidden = (len(params) - 4) // 2
    prepped = []
    for i in range(n_hidden):
        prepped.append(params[2 * i].astype(compute_dtype))                     # (out, in)
        prepped.append(params[2 * i + 1].reshape(-1, 1).astype(jnp.float32))    # (out, 1)
    w_adv, b_adv, w_v, b_v = params[2 * n_hidden:]
    w_head = jnp.concatenate([w_adv, w_v], axis=0).astype(compute_dtype)        # (A+1, H)
    b_head = jnp.concatenate([b_adv.reshape(-1), b_v.reshape(-1)]).reshape(-1, 1)
    prepped += [w_head, b_head.astype(jnp.float32)]                             # (A+1, 1)
    return prepped, n_hidden


@functools.partial(jax.jit, static_argnames=("action_dim", "block_b", "compute_dtype"))
def vanet_forward(x, params, action_dim, *, block_b=4096, compute_dtype=jnp.float32):
    """x: (B, state_dim); params: torch-layout [w1, b1, ..., w_adv, b_adv, w_v, b_v]
    with weights (out_features, in_features) and biases (out_features,).
    Returns Q of shape (B, action_dim)."""
    assert block_b % 128 == 0, "block_b must be a multiple of 128 lanes"
    B, S = x.shape
    prepped, n_hidden = _prep_params(params, compute_dtype)

    # Transpose once in the wrapper: batch -> lane (last) dim.
    x_t = x.T.astype(compute_dtype)                       # (S, B)

    # Single full-extent block for small/medium batches, 128-multiple tiles otherwise.
    tb = B if B <= block_b else block_b
    num_tiles = pl.cdiv(B, tb)

    head_t = pl.pallas_call(
        functools.partial(_vanet_kernel, n_hidden),
        grid=(num_tiles,),
        in_specs=[pl.BlockSpec((S, tb), lambda i: (0, i))]
        # Constant index_maps keep weights/biases VMEM-resident (DMA'd once).
        + [pl.BlockSpec(p.shape, lambda i: (0, 0)) for p in prepped],
        out_specs=pl.BlockSpec((action_dim + 1, tb), lambda i: (0, i)),
        out_shape=jax.ShapeDtypeStruct((action_dim + 1, B), jnp.float32),
        # Fully independent per-tile work -> megacore split on v7x.
        compiler_params=pltpu.CompilerParams(dimension_semantics=("parallel",)),
    )(x_t, *prepped)

    # Tiny XLA epilogue (fused broadcast-subtract at HBM roofline; exact tree-reduced mean).
    adv_t = head_t[:action_dim]                           # (A, B)
    v_t = head_t[action_dim:]                             # (1, B)
    q_t = v_t + adv_t - jnp.mean(adv_t)
    return q_t.T                                          # (B, A)


# ----------------------------------------------------------------------------- params & reference


def make_params(key, state_dim, hidden_layers_dim, action_dim):
    """Synthetic init mimicking torch Linear (uniform +-1/sqrt(fan_in)); torch layout:
    weight (out_features, in_features), bias (out_features,)."""
    params = []
    dims = [state_dim] + list(hidden_layers_dim)
    keys = jax.random.split(key, len(hidden_layers_dim) + 2)

    for i, (din, dout) in enumerate(zip(dims[:-1], dims[1:])):
        kw, kb = jax.random.split(keys[i])
        bound = 1.0 / jnp.sqrt(din)
        params += [jax.random.uniform(kw, (dout, din), jnp.float32, -bound, bound),
                   jax.random.uniform(kb, (dout,), jnp.float32, -bound, bound)]

    last = dims[-1]
    bound = 1.0 / jnp.sqrt(last)
    kw, kb = jax.random.split(keys[-2])
    params += [jax.random.uniform(kw, (action_dim, last), jnp.float32, -bound, bound),
               jax.random.uniform(kb, (action_dim,), jnp.float32, -bound, bound)]
    kw, kb = jax.random.split(keys[-1])
    params += [jax.random.uniform(kw, (1, last), jnp.float32, -bound, bound),
               jax.random.uniform(kb, (1,), jnp.float32, -bound, bound)]
    return params


def vanet_reference(x, params):
    """Pure-JAX reference for correctness checking (matches the torch forward)."""
    n_hidden = (len(params) - 4) // 2
    h = x
    for i in range(n_hidden):
        h = jnp.maximum(h @ params[2 * i].T + params[2 * i + 1], 0.0)
    adv = h @ params[2 * n_hidden].T + params[2 * n_hidden + 1]
    v = h @ params[2 * n_hidden + 2].T + params[2 * n_hidden + 3]
    return v + adv - jnp.mean(adv)


# TODO(synk): complete()/update() (MSELoss + Adam optimizer step) are host-side training
# utilities, not part of the forward pass, and are not implemented as kernels.

if __name__ == "__main__":
    state_dim = 8
    hidden_layers_dim = [32, 32]
    action_dim = 4

    key = jax.random.PRNGKey(0)
    kp, kx1, kx2 = jax.random.split(key, 3)
    params = make_params(kp, state_dim, hidden_layers_dim, action_dim)

    # 1) Small batch -> single full-extent block.
    x1 = jax.random.normal(kx1, (4, state_dim), jnp.float32)
    q1 = jax.block_until_ready(vanet_forward(x1, params, action_dim))
    assert q1.shape == (4, action_dim)
    assert jnp.allclose(q1, vanet_reference(x1, params), atol=1e-4, rtol=1e-4), \
        "single-block path mismatch"

    # 2) Non-multiple batch through the tiled path (ragged final tile, parallel grid,
    #    no pad / no output slice).
    x2 = jax.random.normal(kx2, (200, state_dim), jnp.float32)
    q2 = jax.block_until_ready(vanet_forward(x2, params, action_dim, block_b=128))
    assert q2.shape == (200, action_dim)
    assert jnp.allclose(q2, vanet_reference(x2, params), atol=1e-4, rtol=1e-4), \
        "tiled ragged path mismatch"

    # 3) bf16 MXU feed (f32 bias-add/ReLU/mean), checked loosely against the f32 reference.
    q3 = jax.block_until_ready(
        vanet_forward(x2, params, action_dim, block_b=128, compute_dtype=jnp.bfloat16))
    assert q3.shape == (200, action_dim)
    assert jnp.allclose(q3, vanet_reference(x2, params), atol=1e-1, rtol=1e-1), \
        "bf16 path mismatch"

    print("KERNEL_OK")
</pallas_src>

<mosaic_0001>
module attributes {stable_mosaic.version = 11 : i64} {
  func.func @_vanet_kernel(%arg0: i32, %arg1: memref<8x4xf32, #tpu.memory_space<vmem>>, %arg2: memref<32x8xf32, #tpu.memory_space<vmem>>, %arg3: memref<32x1xf32, #tpu.memory_space<vmem>>, %arg4: memref<32x32xf32, #tpu.memory_space<vmem>>, %arg5: memref<32x1xf32, #tpu.memory_space<vmem>>, %arg6: memref<5x32xf32, #tpu.memory_space<vmem>>, %arg7: memref<5x1xf32, #tpu.memory_space<vmem>>, %arg8: memref<5x4xf32, #tpu.memory_space<vmem>>) attributes {dimension_semantics = [#tpu.dimension_semantics<parallel>], iteration_bounds = array<i64: 1>, scalar_prefetch = 0 : i64, scratch_operands = 0 : i64, tpu.core_type = #tpu.core_type<tc>, window_params = [{transform_indices = @transform_0, window_bounds = array<i64: 8, 4>}, {pipeline_mode = #tpu.pipeline_mode<synchronous>, transform_indices = @transform_1, window_bounds = array<i64: 32, 8>}, {pipeline_mode = #tpu.pipeline_mode<synchronous>, transform_indices = @transform_2, window_bounds = array<i64: 32, 1>}, {pipeline_mode = #tpu.pipeline_mode<synchronous>, transform_indices = @transform_3, window_bounds = array<i64: 32, 32>}, {pipeline_mode = #tpu.pipeline_mode<synchronous>, transform_indices = @transform_4, window_bounds = array<i64: 32, 1>}, {pipeline_mode = #tpu.pipeline_mode<synchronous>, transform_indices = @transform_5, window_bounds = array<i64: 5, 32>}, {pipeline_mode = #tpu.pipeline_mode<synchronous>, transform_indices = @transform_6, window_bounds = array<i64: 5, 1>}, {transform_indices = @transform_7, window_bounds = array<i64: 5, 4>}]} {
    %c0 = arith.constant 0 : index
    %c0_0 = arith.constant 0 : index
    %0 = vector.load %arg1[%c0, %c0_0] : memref<8x4xf32, #tpu.memory_space<vmem>>, vector<8x4xf32>
    %c0_1 = arith.constant 0 : index
    %c0_2 = arith.constant 0 : index
    %1 = vector.load %arg2[%c0_1, %c0_2] : memref<32x8xf32, #tpu.memory_space<vmem>>, vector<32x8xf32>
    %c0_3 = arith.constant 0 : index
    %c0_4 = arith.constant 0 : index
    %2 = vector.load %arg3[%c0_3, %c0_4] : memref<32x1xf32, #tpu.memory_space<vmem>>, vector<32x1xf32>
    %cst = arith.constant dense<0.000000e+00> : vector<32x4xf32>
    %3 = tpu.matmul %1, %0, %cst {dimension_numbers = #tpu.dot_dimension_numbers<[1], [0], [0], [1], [0, 0, 1, 1], [], []>} : vector<32x8xf32>, vector<8x4xf32>, vector<32x4xf32> -> vector<32x4xf32>
    %4 = vector.broadcast %2 : vector<32x1xf32> to vector<32x4xf32>
    %5 = arith.addf %3, %4 : vector<32x4xf32>
    %cst_5 = arith.constant 0.000000e+00 : f32
    %6 = vector.broadcast %cst_5 : f32 to vector<32x4xf32>
    %7 = arith.maximumf %5, %6 : vector<32x4xf32>
    %c0_6 = arith.constant 0 : index
    %c0_7 = arith.constant 0 : index
    %8 = vector.load %arg4[%c0_6, %c0_7] : memref<32x32xf32, #tpu.memory_space<vmem>>, vector<32x32xf32>
    %c0_8 = arith.constant 0 : index
    %c0_9 = arith.constant 0 : index
    %9 = vector.load %arg5[%c0_8, %c0_9] : memref<32x1xf32, #tpu.memory_space<vmem>>, vector<32x1xf32>
    %cst_10 = arith.constant dense<0.000000e+00> : vector<32x4xf32>
    %10 = tpu.matmul %8, %7, %cst_10 {dimension_numbers = #tpu.dot_dimension_numbers<[1], [0], [0], [1], [0, 0, 1, 1], [], []>} : vector<32x32xf32>, vector<32x4xf32>, vector<32x4xf32> -> vector<32x4xf32>
    %11 = vector.broadcast %9 : vector<32x1xf32> to vector<32x4xf32>
    %12 = arith.addf %10, %11 : vector<32x4xf32>
    %cst_11 = arith.constant 0.000000e+00 : f32
    %13 = vector.broadcast %cst_11 : f32 to vector<32x4xf32>
    %14 = arith.maximumf %12, %13 : vector<32x4xf32>
    %c0_12 = arith.constant 0 : index
    %c0_13 = arith.constant 0 : index
    %15 = vector.load %arg6[%c0_12, %c0_13] : memref<5x32xf32, #tpu.memory_space<vmem>>, vector<5x32xf32>
    %c0_14 = arith.constant 0 : index
    %c0_15 = arith.constant 0 : index
    %16 = vector.load %arg7[%c0_14, %c0_15] : memref<5x1xf32, #tpu.memory_space<vmem>>, vector<5x1xf32>
    %cst_16 = arith.constant dense<0.000000e+00> : vector<5x4xf32>
    %17 = tpu.matmul %15, %14, %cst_16 {dimension_numbers = #tpu.dot_dimension_numbers<[1], [0], [0], [1], [0, 0, 1, 1], [], []>} : vector<5x32xf32>, vector<32x4xf32>, vector<5x4xf32> -> vector<5x4xf32>
    %18 = vector.broadcast %16 : vector<5x1xf32> to vector<5x4xf32>
    %19 = arith.addf %17, %18 : vector<5x4xf32>
    %c0_17 = arith.constant 0 : index
    %c0_18 = arith.constant 0 : index
    %20 = vector.load %arg8[%c0_17, %c0_18] : memref<5x4xf32, #tpu.memory_space<vmem>>, vector<5x4xf32>
    tpu.vector_store %arg8[%c0_17, %c0_18], %19 {strides = array<i32>} : memref<5x4xf32, #tpu.memory_space<vmem>>, vector<5x4xf32>,
    return
  }
  func.func @transform_0(%arg0: i32) -> (i32, i32) {
    %c0_i32 = arith.constant 0 : i32
    %c0_i32_0 = arith.constant 0 : i32
    return %c0_i32, %arg0 : i32, i32
  }
  func.func @transform_1(%arg0: i32) -> (i32, i32) {
    %c0_i32 = arith.constant 0 : i32
    %c0_i32_0 = arith.constant 0 : i32
    %c0_i32_1 = arith.constant 0 : i32
    return %c0_i32, %c0_i32_0 : i32, i32
  }
  func.func @transform_2(%arg0: i32) -> (i32, i32) {
    %c0_i32 = arith.constant 0 : i32
    %c0_i32_0 = arith.constant 0 : i32
    %c0_i32_1 = arith.constant 0 : i32
    return %c0_i32, %c0_i32_0 : i32, i32
  }
  func.func @transform_3(%arg0: i32) -> (i32, i32) {
    %c0_i32 = arith.constant 0 : i32
    %c0_i32_0 = arith.constant 0 : i32
    %c0_i32_1 = arith.constant 0 : i32
    return %c0_i32, %c0_i32_0 : i32, i32
  }
  func.func @transform_4(%arg0: i32) -> (i32, i32) {
    %c0_i32 = arith.constant 0 : i32
    %c0_i32_0 = arith.constant 0 : i32
    %c0_i32_1 = arith.constant 0 : i32
    return %c0_i32, %c0_i32_0 : i32, i32
  }
  func.func @transform_5(%arg0: i32) -> (i32, i32) {
    %c0_i32 = arith.constant 0 : i32
    %c0_i32_0 = arith.constant 0 : i32
    %c0_i32_1 = arith.constant 0 : i32
    return %c0_i32, %c0_i32_0 : i32, i32
  }
  func.func @transform_6(%arg0: i32) -> (i32, i32) {
    %c0_i32 = arith.constant 0 : i32
    %c0_i32_0 = arith.constant 0 : i32
    %c0_i32_1 = arith.constant 0 : i32
    return %c0_i32, %c0_i32_0 : i32, i32
  }
  func.func @transform_7(%arg0: i32) -> (i32, i32) {
    %c0_i32 = arith.constant 0 : i32
    %c0_i32_0 = arith.constant 0 : i32
    return %c0_i32, %arg0 : i32, i32
  }
}

</mosaic_0001>

<bundles_post_ra>
// kernel: vanet_forward.1
= control target key start
LH: loop header
LB: loop body
LE: loop exit
PB: predicated region body
PF: predicated region fallthrough
CT: control target
= control target key end

     0   :  { %vm55_vm0 = vcmask 64512   ;;  %v453_v3 = vmov 0   ;;  %vm185_vm1 = vcmask 261120   ;;  %v454_v37 = vmov 0.0|0.0   ;;  %s566_s0 = inlined_call_operand.vmem [shape: f32[8,4], index: 0, kind: input, shape index: {}]   ;;  %s567_s1 = inlined_call_operand.vmem [shape: f32[32,8], index: 1, kind: input, shape index: {}]   ;;  %s568_s2 = inlined_call_operand.vmem [shape: f32[32,1], index: 2, kind: input, shape index: {}]   ;;  %s569_s4 = inlined_call_operand.vmem [shape: f32[32,1], index: 4, kind: input, shape index: {}]   ;;  %s570_s6 = inlined_call_operand.vmem [shape: f32[5,1], index: 6, kind: input, shape index: {}]   ;;  %s571_s3 = inlined_call_operand.vmem [shape: f32[32,32], index: 3, kind: input, shape index: {}]   ;;  %s572_s5 = inlined_call_operand.vmem [shape: f32[5,32], index: 5, kind: input, shape index: {}]   ;;  %s573_s7 = inlined_call_operand.vmem [shape: f32[5,4], index: 7, kind: output, shape index: {}]  }
   0x1   :  { %v26_v0 = vld [vmem:[%s566_s0] sm:$0xff]  ;;  %v28_v2 = vld [vmem:[%s567_s1 + $0x8] sm:$0xff]  ;;  %451 = vset.pattern.permute.xlu0 %v453_v3  ;;  %452 = vset.pattern.permute.xlu1 %v453_v3  ;;  %v29_v4 = vld [vmem:[%s567_s1 + $0x10] sm:$0xff]  ;;  %vm455_vm2 = vmmov 0   ;;  %v456_v38 = vmov 0.0   ;;  %vm367_vm3 = vcmask 28672  }
   0x2   :  { %v27_v1 = vld [vmem:[%s567_s1] sm:$0xff]  ;;  %400 = vmatprep.subr.mxu0 %v26_v0  ;;  %v33_v6 = vld [vmem:[%s568_s2 + $0x10] sm:$0xff]  ;;  %v32_v7 = vld [vmem:[%s568_s2 + $0x8] sm:$0xff] }
   0x3   :  { %402 = vmatprep.mubr.msk.f32.mxu0 %vm55_vm0, %v27_v1  ;;  %v31_v5 = vld [vmem:[%s568_s2] sm:$0xff]  ;;  %401 = vmatpush3.msra.mxu0 %v26_v0  ;;  %v30_v8 = vld [vmem:[%s567_s1 + $0x18] sm:$0xff]  ;;  %v162_v11 = vld [vmem:[%s569_s4 + $0x8] sm:$0xff] }
   0x4   :  { %37 = vperm.xlu0 %451, %v31_v5   ;;  %403 = vmatmul.mubr.msk.f32.vlgmr.msra.gmra.mrb[0].mxu0 %vm55_vm0, %v28_v2  ;;  %v34_v9 = vld [vmem:[%s568_s2 + $0x18] sm:$0xff]  ;;  %v161_v10 = vld [vmem:[%s569_s4] sm:$0xff]  ;;  %v163_v12 = vld [vmem:[%s569_s4 + $0x10] sm:$0xff] }
   0x5   :  { %47 = vperm.xlu1 %452, %v33_v6   ;;  %405 = vmatprep.mubr.msk.f32.mxu0 %vm55_vm0, %v29_v4  ;;  %v164_v13 = vld [vmem:[%s569_s4 + $0x18] sm:$0xff]  ;;  %v288_v14 = vld [vmem:[%s570_s6] sm:$0x1f]  ;;  %v158_v34 = vld [vmem:[%s571_s3 + $0x8] sm:$0xff] }
   0x6   :  { %v157_v15 = vld [vmem:[%s571_s3] sm:$0xff]  ;;  %v159_v35 = vld [vmem:[%s571_s3 + $0x10] sm:$0xff]  ;;  %v160_v36 = vld [vmem:[%s571_s3 + $0x18] sm:$0xff]  ;;  %441 = vmatprep.subr.bf16.mxu0 %v454_v37 }
   0x7   :  { %416 = vmatprep.mubr.msk.f32.mxu1 %vm185_vm1, %v157_v15  ;;  %v287_v57 = vld [vmem:[%s572_s5] sm:$0x1f] }
   0x8   :  { %42 = vperm.xlu0 %451, %v32_v7   ;;  %406 = vmatmul.mubr.msk.f32.gmra.mrb[2].mxu0 %vm55_vm0, %v30_v8 }
   0x9   :  { %52 = vperm.xlu1 %452, %v34_v9   ;;  %430 = vmatprep.mubr.msk.f32.mxu0 %vm455_vm2, %v456_v38 }
   0xc   :  { %167 = vperm.xlu0 %451, %v161_v10  }
   0xd   :  { %172 = vperm.xlu1 %452, %v162_v11  }
  0x10   :  { %177 = vperm.xlu0 %451, %v163_v12  }
  0x11   :  { %182 = vperm.xlu1 %452, %v164_v13  }
  0x14   :  { %291 = vperm.xlu0 %451, %v288_v14  }
  0x83   :  { %v38_v16 = vpop.permute.xlu0 %37 }
  0x84   :  { %v48_v17 = vpop.permute.xlu1 %47 }
  0x87   :  { %v43_v18 = vpop.permute.xlu0 %42 }
  0x88   :  { %v53_v24 = vpop.permute.xlu1 %52 }
  0x8b   :  { %v168_v40 = vpop.permute.xlu0 %167 }
  0x8c   :  { %v173_v39 = vpop.permute.xlu1 %172 }
  0x8f   :  { %v178_v49 = vpop.permute.xlu0 %177 }
  0x90   :  { %v183_v46 = vpop.permute.xlu1 %182 }
  0x93   :  { %v292_v58 = vpop.permute.xlu0 %291 }
  0xd7   :  { %v404_v19 = vpop.f32.mrb[0].mxu0 }
  0xd8   :  { %v140_v20 = vadd.f32 %v404_v19, %v43_v18  ;;  %v134_v21 = vpop.f32.mrb[1].mxu0 }
  0xd9   :  { %v135_v22 = vadd.f32 %v134_v21, %v38_v16 }
  0xda   :  { %v154_v23 = vmax.f32 %v140_v20, 0.0 }
  0xdb   :  { %v153_v25 = vmax.f32 %v135_v22, 0.0  ;;  %v407_v26 = vpop.f32.mrb[2].mxu0 }
  0xdc   :  { %v150_v27 = vadd.f32 %v407_v26, %v53_v24  ;;  %v144_v28 = vpop.f32.mrb[3].mxu0 }
  0xdd   :  { %v145_v29 = vadd.f32 %v144_v28, %v48_v17  ;;  %v433_v30 = vpack.c.bf16 %v154_v23, %v153_v25 }
  0xde   :  { %v156_v31 = vmax.f32 %v150_v27, 0.0 }
  0xdf   :  { %v155_v32 = vmax.f32 %v145_v29, 0.0  ;;  %434 = vmatprep.subr.bf16.mxu1 %v433_v30 }
  0xe0   :  { %436 = vmatpush3.bf16.msra.mxu1 %v433_v30 }
  0xe1   :  { %v437_v33 = vpack.c.bf16 %v156_v31, %v155_v32 }
  0xe3   :  { %438 = vmatprep.subr.bf16.mxu1 %v437_v33 }
  0xe4   :  { %440 = vmatpush3.bf16.msra.mxu1 %v437_v33 }
  0xe7   :  { %417 = vmatmul.mubr.msk.f32.vlgmr.msra.gmra.mrb[0].mxu1 %vm185_vm1, %v158_v34 }
  0xe8   :  { %419 = vmatprep.mubr.msk.f32.mxu1 %vm185_vm1, %v159_v35 }
  0xeb   :  { %420 = vmatmul.mubr.msk.f32.gmra.mrb[2].mxu1 %vm185_vm1, %v160_v36 }
 0x1ba   :  { %v418_v41 = vpop.f32.mrb[0].mxu1 }
 0x1bb   :  { %v270_v42 = vadd.f32 %v418_v41, %v173_v39  ;;  %v264_v43 = vpop.f32.mrb[1].mxu1 }
 0x1bc   :  { %v265_v44 = vadd.f32 %v264_v43, %v168_v40 }
 0x1bd   :  { %v284_v45 = vmax.f32 %v270_v42, 0.0 }
 0x1be   :  { %v283_v47 = vmax.f32 %v265_v44, 0.0  ;;  %v421_v48 = vpop.f32.mrb[2].mxu1 }
 0x1bf   :  { %v280_v50 = vadd.f32 %v421_v48, %v183_v46  ;;  %v274_v51 = vpop.f32.mrb[3].mxu1 }
 0x1c0   :  { %v442_v52 = vpack.c.bf16 %v284_v45, %v283_v47  ;;  %v275_v53 = vadd.f32 %v274_v51, %v178_v49 }
 0x1c1   :  { %v286_v54 = vmax.f32 %v280_v50, 0.0 }
 0x1c2   :  { %v285_v55 = vmax.f32 %v275_v53, 0.0  ;;  %443 = vmatpush3.bf16.msra.mxu0 %v442_v52 }
 0x1c3   :  { %444 = vmatprep.subr.bf16.mxu0 %v454_v37 }
 0x1c4   :  { %v445_v56 = vpack.c.bf16 %v286_v54, %v285_v55 }
 0x1c6   :  { %446 = vmatpush3.bf16.msra.mxu0 %v445_v56 }
 0x1c9   :  { %431 = vmatmul.mubr.msk.f32.vlgmr.msra.gmra.mrb[4].mxu0 %vm185_vm1, %v287_v57 }
 0x29c   :  { %v363_v59 = vpop.f32.mrb[4].mxu0 }
 0x29d   :  { %v364_v60 = vadd.f32 %v363_v59, %v292_v58  ;;  %v432_v61 = vpop.f32.mrb[5].mxu0 }
 0x29f   :  { %368 = vst.msk [vmem:[%s573_s7] sm:$0x1f] %vm367_vm3, %v364_v60 }

</bundles_post_ra>
